<compile_context>
chip_gen: v5e
topology: v5e:2x2
jax: 0.10.0
libtpu: 0.0.40
codegen_flags: <defaults>
</compile_context>

<pallas_src>
import functools

import jax
import jax.numpy as jnp
from jax.experimental import pallas as pl
from jax.experimental.pallas import tpu as pltpu


def _vmem_limit_bytes():
    """Generation-aware scoped-VMEM cap: ~3/4 of physical VMEM
    (-> ~96 MiB on v5e/v6e's 128 MiB, ~48 MiB on v7x's 64 MiB)."""
    cap = 64 * 1024 * 1024  # conservative fallback (v7x physical size)
    try:
        info = pltpu.get_tpu_info()
        cap = int(getattr(info, "vmem_capacity_bytes", cap))
    except Exception:
        pass
    return max(32 * 1024 * 1024, min((cap * 3) // 4, 100 * 1024 * 1024))


def _has_bf16_eup():
    """bf16 transcendental (EUP) path exists on v6e/v7x but not v5e/v4/..."""
    try:
        kind = jax.devices()[0].device_kind.lower()
    except Exception:
        return True
    return not any(tag in kind for tag in ("v2", "v3", "v4", "v5"))


def _fit_tile(dim, pref, align):
    """Largest tile <= pref that divides dim and is a multiple of `align`
    (falls back to the full extent, which bypasses the (8,128) rule).
    TODO(synk): non-divisible large dims fall back to a full-extent block;
    add padding/masking for ragged shapes if they ever appear."""
    if dim <= pref:
        return dim
    t = (pref // align) * align
    while t >= align:
        if dim % t == 0:
            return t
        t -= align
    return dim


def _pick_head_pack(num_heads, head_dim, target_lanes=256):
    """Smallest head-group hp (dividing num_heads) such that hp*head_dim is a
    multiple of 128 lanes and, if possible, >= target_lanes (wider DMAs and
    unmasked stores); otherwise the widest valid pack."""
    valid = [hp for hp in range(1, num_heads + 1)
             if num_heads % hp == 0 and (hp * head_dim) % 128 == 0]
    if not valid:
        raise ValueError(
            "unsupported num_heads/head_dim for 128-lane head packing "
            f"(num_heads={num_heads}, head_dim={head_dim})")
    for hp in valid:
        if hp * head_dim >= target_lanes:
            return hp
    return valid[-1]


# ----------------------------------------------------------------------------
# Kernel 1: tiled dense matmul (qkv projection and output projection)
# ----------------------------------------------------------------------------
def _matmul_kernel(x_ref, w_ref, o_ref, acc_ref):
    k = pl.program_id(2)

    @pl.when(k == 0)
    def _():
        acc_ref[...] = jnp.zeros_like(acc_ref)

    acc_ref[...] += jnp.dot(x_ref[...], w_ref[...],
                            preferred_element_type=jnp.float32)

    @pl.when(k == pl.num_programs(2) - 1)
    def _():
        o_ref[...] = acc_ref[...].astype(o_ref.dtype)


def linear(x2d, w, *, out_dtype=None, tm=512, tn=512, tk=512):
    """x2d: (M, K) @ w: (K, N) -> (M, N), tiled + auto-pipelined.

    bf16 512^3 tiles keep the double-buffered VMEM footprint ~4-5 MiB, well
    inside even v7x's 64 MiB, while cutting x/weight HBM re-reads vs smaller
    tiles.  f32 accumulation in VMEM scratch."""
    M, K = x2d.shape
    K2, N = w.shape
    assert K == K2
    out_dtype = x2d.dtype if out_dtype is None else out_dtype
    tm = _fit_tile(M, tm, 16)
    tn = _fit_tile(N, tn, 128)
    tk = _fit_tile(K, tk, 128)
    grid = (M // tm, N // tn, K // tk)
    return pl.pallas_call(
        _matmul_kernel,
        out_shape=jax.ShapeDtypeStruct((M, N), out_dtype),
        grid_spec=pltpu.PrefetchScalarGridSpec(
            num_scalar_prefetch=0,
            grid=grid,
            in_specs=[
                pl.BlockSpec((tm, tk), lambda i, j, k: (i, k)),
                pl.BlockSpec((tk, tn), lambda i, j, k: (k, j)),
            ],
            out_specs=pl.BlockSpec((tm, tn), lambda i, j, k: (i, j)),
            scratch_shapes=[pltpu.VMEM((tm, tn), jnp.float32)],
        ),
        compiler_params=pltpu.CompilerParams(
            dimension_semantics=("parallel", "parallel", "arbitrary"),
            vmem_limit_bytes=_vmem_limit_bytes(),
        ),
    )(x2d, w)


# ----------------------------------------------------------------------------
# Kernel 2: flash-style attention with head packing.
# Reads q/k/v directly out of the (B, L, 3C) qkv-projection output via
# BlockSpec index maps; writes merged-head (B, L, C) output.
# ----------------------------------------------------------------------------
def _flash_attn_kernel(q_ref, k_ref, v_ref, o_ref, m_sc, l_sc, acc_sc,
                       *, hp, hd, exp_dtype):
    ki = pl.program_id(3)

    @pl.when(ki == 0)
    def _():
        m_sc[...] = jnp.full(m_sc.shape, -jnp.inf, jnp.float32)
        l_sc[...] = jnp.zeros(l_sc.shape, jnp.float32)
        acc_sc[...] = jnp.zeros(acc_sc.shape, jnp.float32)

    q_blk = q_ref[0]   # (tq,  hp*hd)  bf16 (softmax scale already in Wq)
    k_blk = k_ref[0]   # (tkv, hp*hd)
    v_blk = v_ref[0]   # (tkv, hp*hd)

    for h in range(hp):                      # static unroll over packed heads
        lo = h * hd
        q_h = q_blk[:, lo:lo + hd]
        k_h = k_blk[:, lo:lo + hd]
        v_h = v_blk[:, lo:lo + hd]

        # QK^T without transposing K (NT dot_general); f32 acc on the MXU.
        s = jax.lax.dot_general(
            q_h, k_h, (((1,), (1,)), ((), ())),
            preferred_element_type=jnp.float32)            # (tq, tkv) f32

        m_prev = m_sc[h]                                   # (tq, 1) f32
        m_new = jnp.maximum(m_prev, jnp.max(s, axis=-1, keepdims=True))
        alpha = jnp.exp(m_prev - m_new)                    # tiny, f32 exp
        # bf16 exponentials (bf16 EUP path) on v6e/v7x; f32 on v5e.
        p = jnp.exp((s - m_new).astype(exp_dtype))         # (tq, tkv)
        l_sc[h] = alpha * l_sc[h] + jnp.sum(
            p.astype(jnp.float32), axis=-1, keepdims=True)
        acc_sc[h] = alpha * acc_sc[h] + jnp.dot(
            p.astype(v_h.dtype), v_h, preferred_element_type=jnp.float32)
        m_sc[h] = m_new

    @pl.when(ki == pl.num_programs(3) - 1)
    def _():
        # Normalize and emit all packed heads as one lane-dense (tq, hp*hd)
        # store (dense, unmasked HBM writeback; once per q tile).
        outs = [acc_sc[h] * pl.reciprocal(l_sc[h], approx=True)
                for h in range(hp)]
        o_ref[0] = jnp.concatenate(outs, axis=-1).astype(o_ref.dtype)


def flash_attention(qkv, *, num_heads, head_dim, head_pack, tq=256, tkv=256):
    """qkv: (B, L, 3*C) laid out [q | k | v], each section head-major.
    Returns (B, L, C) with heads merged along the last dim."""
    B, L, three_c = qkv.shape
    C = num_heads * head_dim
    assert three_c == 3 * C
    hp = head_pack
    lane = hp * head_dim
    n_groups = num_heads // hp

    tq = _fit_tile(L, tq, 16)      # bf16 sublane pack = 16 rows / vreg
    tkv = _fit_tile(L, tkv, 128)   # lane-dense (tq, tkv) score/p tiles
    grid = (B, n_groups, L // tq, L // tkv)

    exp_dtype = (jnp.bfloat16
                 if (_has_bf16_eup() and qkv.dtype == jnp.bfloat16)
                 else jnp.float32)

    # q/k/v are "split" from the same qkv array purely via index maps over the
    # last (3C) axis -> no XLA slices/transposes between the two kernels.
    q_spec = pl.BlockSpec((1, tq, lane), lambda b, g, qi, ki: (b, qi, g))
    k_spec = pl.BlockSpec((1, tkv, lane),
                          lambda b, g, qi, ki: (b, ki, n_groups + g))
    v_spec = pl.BlockSpec((1, tkv, lane),
                          lambda b, g, qi, ki: (b, ki, 2 * n_groups + g))
    o_spec = pl.BlockSpec((1, tq, lane), lambda b, g, qi, ki: (b, qi, g))

    kernel = functools.partial(_flash_attn_kernel,
                               hp=hp, hd=head_dim, exp_dtype=exp_dtype)
    return pl.pallas_call(
        kernel,
        out_shape=jax.ShapeDtypeStruct((B, L, C), qkv.dtype),
        grid_spec=pltpu.PrefetchScalarGridSpec(
            num_scalar_prefetch=0,
            grid=grid,
            in_specs=[q_spec, k_spec, v_spec],
            out_specs=o_spec,
            scratch_shapes=[
                pltpu.VMEM((hp, tq, 1), jnp.float32),         # running max m
                pltpu.VMEM((hp, tq, 1), jnp.float32),         # running sum l
                pltpu.VMEM((hp, tq, head_dim), jnp.float32),  # output acc
            ],
        ),
        compiler_params=pltpu.CompilerParams(
            dimension_semantics=("parallel", "parallel", "parallel",
                                 "arbitrary"),
            vmem_limit_bytes=_vmem_limit_bytes(),
        ),
    )(qkv, qkv, qkv)


# ----------------------------------------------------------------------------
# Module wrapper
# ----------------------------------------------------------------------------
class SelfAttentionPallas:
    def __init__(self, dim, head_dim=64, qkv_bias=False, qk_scale=None,
                 attn_drop=0.0, proj_drop=0.0, *, key):
        assert dim % head_dim == 0, "dim must be divisible by head_dim"
        self.dim = dim
        self.head_dim = head_dim
        self.num_heads = dim // head_dim
        # Honor an explicit qk_scale (including 0.0) like the fixed module.
        self.scale = head_dim ** (-0.5) if qk_scale is None else qk_scale
        self.attn_drop_p = attn_drop
        self.proj_drop_p = proj_drop
        # TODO(synk): qkv_bias=True and dropout p>0 (training) not implemented;
        # module defaults (bias=False, eval / p=0.0) make them no-ops here.
        assert not qkv_bias, "qkv_bias=True not implemented"
        self.head_pack = _pick_head_pack(self.num_heads, head_dim)

        k1, k2 = jax.random.split(key)
        # Weights stored transposed to (in, out) so y = x @ W; the 3*dim
        # columns are ordered [q | k | v], head-major within each, matching
        # the PyTorch reshape(B, N, 3, H, hd).
        w_qkv = jax.random.normal(k1, (dim, 3 * dim), jnp.float32) * 0.02
        w_proj = jax.random.normal(k2, (dim, dim), jnp.float32) * 0.02
        self.w_qkv_f32 = w_qkv          # unscaled f32 copies (reference only)
        self.w_proj_f32 = w_proj
        # Fold the softmax scale into the q columns (mathematically identical
        # to scaling the scores) and store compute weights in bf16 (native MXU
        # rate on v5e/v6e/v7x, half the HBM traffic).
        self.w_qkv = w_qkv.at[:, :dim].multiply(self.scale).astype(jnp.bfloat16)
        self.w_proj = w_proj.astype(jnp.bfloat16)

    def __call__(self, x):
        B, N, C = x.shape
        assert C == self.dim

        # 1) qkv projection: tiled/pipelined bf16 Pallas matmul on (B*N, C),
        #    bf16 output (it is written once and re-read 3x by attention).
        x_bf = x.astype(jnp.bfloat16)
        qkv = linear(x_bf.reshape(B * N, C), self.w_qkv,
                     out_dtype=jnp.bfloat16)               # (B*N, 3C)
        qkv = qkv.reshape(B, N, 3 * C)                     # metadata-only

        # 2) flash attention; q/k/v + head-group selection via BlockSpec index
        #    maps, output already merged-head (B, N, C) bf16.
        y = flash_attention(qkv, num_heads=self.num_heads,
                            head_dim=self.head_dim,
                            head_pack=self.head_pack)

        # 3) output projection, consuming (B*N, C) directly; emits x.dtype.
        out = linear(y.reshape(B * N, C), self.w_proj, out_dtype=x.dtype)
        return out.reshape(B, N, C)


# ----------------------------------------------------------------------------
# Pure-JAX reference (matches the PyTorch forward, eval / p=0.0), f32.
# ----------------------------------------------------------------------------
def _reference(x, w_qkv, w_proj, num_heads, head_dim, scale):
    B, N, C = x.shape
    qkv = (x.reshape(B * N, C) @ w_qkv).reshape(B, N, 3, num_heads, head_dim)
    qkv = jnp.transpose(qkv, (2, 0, 3, 1, 4))
    q, k, v = qkv[0], qkv[1], qkv[2]
    s = jnp.einsum("bhqd,bhkd->bhqk", q, k) * scale
    p = jax.nn.softmax(s, axis=-1)
    y = jnp.einsum("bhqk,bhkd->bhqd", p, v)
    y = jnp.transpose(y, (0, 2, 1, 3)).reshape(B, N, C)
    return (y.reshape(B * N, C) @ w_proj).reshape(B, N, C)


if __name__ == "__main__":
    key = jax.random.PRNGKey(0)
    k_param, k_x1, k_x2 = jax.random.split(key, 3)

    D = 128                       # dim=128, head_dim=64 -> num_heads=2
    module = SelfAttentionPallas(dim=D, head_dim=64, key=k_param)

    # Loose-ish tolerance: bf16 weights/activations on the MXU, bf16 softmax
    # exponentials (v6e/v7x) and approximate EUP reciprocal for 1/l.
    ATOL = RTOL = 2e-2

    # Small case (single grid step per axis).
    B, L = 2, 8
    x = jax.random.normal(k_x1, (B, L, D), jnp.float32)
    out = jax.block_until_ready(module(x))
    ref = _reference(x, module.w_qkv_f32, module.w_proj_f32,
                     module.num_heads, module.head_dim, module.scale)
    assert out.shape == (B, L, D)
    err = float(jnp.max(jnp.abs(out - ref)))
    assert jnp.allclose(out, ref, atol=ATOL, rtol=RTOL), \
        f"small-case mismatch vs reference (max abs err {err})"

    # Larger case: exercises multi-tile q/kv grid (online-softmax carry,
    # pl.when init/finalize) and the pipelined projection matmuls.
    B2, L2 = 2, 512
    x2 = jax.random.normal(k_x2, (B2, L2, D), jnp.float32)
    out2 = jax.block_until_ready(module(x2))
    ref2 = _reference(x2, module.w_qkv_f32, module.w_proj_f32,
                      module.num_heads, module.head_dim, module.scale)
    assert out2.shape == (B2, L2, D)
    err2 = float(jnp.max(jnp.abs(out2 - ref2)))
    assert jnp.allclose(out2, ref2, atol=ATOL, rtol=RTOL), \
        f"multi-tile mismatch vs reference (max abs err {err2})"

    print("KERNEL_OK")
</pallas_src>

<mosaic_0001>
module attributes {stable_mosaic.version = 11 : i64} {
  func.func @_matmul_kernel(%arg0: i32, %arg1: i32, %arg2: i32, %arg3: memref<16x128xbf16, #tpu.memory_space<vmem>>, %arg4: memref<128x384xbf16, #tpu.memory_space<vmem>>, %arg5: memref<16x384xbf16, #tpu.memory_space<vmem>>, %arg6: memref<16x384xf32, #tpu.memory_space<vmem>>) attributes {dimension_semantics = [#tpu.dimension_semantics<parallel>, #tpu.dimension_semantics<parallel>, #tpu.dimension_semantics<arbitrary>], iteration_bounds = array<i64: 1, 1, 1>, scalar_prefetch = 0 : i64, scratch_operands = 1 : i64, tpu.core_type = #tpu.core_type<tc>, window_params = [{transform_indices = @transform_0, window_bounds = array<i64: 16, 128>}, {transform_indices = @transform_1, window_bounds = array<i64: 128, 384>}, {transform_indices = @transform_2, window_bounds = array<i64: 16, 384>}]} {
    %c0_i32 = arith.constant 0 : i32
    %0 = arith.cmpi eq, %arg2, %c0_i32 : i32
    %1 = arith.extui %0 : i1 to i32
    %c0_i32_0 = arith.constant 0 : i32
    %2 = arith.cmpi ne, %1, %c0_i32_0 : i32
    scf.if %2 {
      %cst_10 = arith.constant 0.000000e+00 : f32
      %12 = vector.broadcast %cst_10 : f32 to vector<16x384xf32>
      %c0_11 = arith.constant 0 : index
      %c0_12 = arith.constant 0 : index
      %13 = vector.load %arg6[%c0_11, %c0_12] : memref<16x384xf32, #tpu.memory_space<vmem>>, vector<16x384xf32>
      tpu.vector_store %arg6[%c0_11, %c0_12], %12 {strides = array<i32>} : memref<16x384xf32, #tpu.memory_space<vmem>>, vector<16x384xf32>,
    } else {
    }
    %c0 = arith.constant 0 : index
    %c0_1 = arith.constant 0 : index
    %3 = vector.load %arg6[%c0, %c0_1] : memref<16x384xf32, #tpu.memory_space<vmem>>, vector<16x384xf32>
    %c0_2 = arith.constant 0 : index
    %c0_3 = arith.constant 0 : index
    %4 = vector.load %arg3[%c0_2, %c0_3] : memref<16x128xbf16, #tpu.memory_space<vmem>>, vector<16x128xbf16>
    %c0_4 = arith.constant 0 : index
    %c0_5 = arith.constant 0 : index
    %5 = vector.load %arg4[%c0_4, %c0_5] : memref<128x384xbf16, #tpu.memory_space<vmem>>, vector<128x384xbf16>
    %cst = arith.constant dense<0.000000e+00> : vector<16x384xf32>
    %6 = tpu.matmul %4, %5, %cst {dimension_numbers = #tpu.dot_dimension_numbers<[1], [0], [0], [1], [0, 0, 1, 1], [], []>} : vector<16x128xbf16>, vector<128x384xbf16>, vector<16x384xf32> -> vector<16x384xf32>
    %7 = arith.addf %3, %6 : vector<16x384xf32>
    %c0_6 = arith.constant 0 : index
    %c0_7 = arith.constant 0 : index
    %8 = vector.load %arg6[%c0_6, %c0_7] : memref<16x384xf32, #tpu.memory_space<vmem>>, vector<16x384xf32>
    tpu.vector_store %arg6[%c0_6, %c0_7], %7 {strides = array<i32>} : memref<16x384xf32, #tpu.memory_space<vmem>>, vector<16x384xf32>,
    %c0_i32_8 = arith.constant 0 : i32
    %9 = arith.cmpi eq, %arg2, %c0_i32_8 : i32
    %10 = arith.extui %9 : i1 to i32
    %c0_i32_9 = arith.constant 0 : i32
    %11 = arith.cmpi ne, %10, %c0_i32_9 : i32
    scf.if %11 {
      %c0_10 = arith.constant 0 : index
      %c0_11 = arith.constant 0 : index
      %12 = vector.load %arg6[%c0_10, %c0_11] : memref<16x384xf32, #tpu.memory_space<vmem>>, vector<16x384xf32>
      %13 = arith.truncf %12 : vector<16x384xf32> to vector<16x384xbf16>
      %c0_12 = arith.constant 0 : index
      %c0_13 = arith.constant 0 : index
      %14 = vector.load %arg5[%c0_12, %c0_13] : memref<16x384xbf16, #tpu.memory_space<vmem>>, vector<16x384xbf16>
      tpu.vector_store %arg5[%c0_12, %c0_13], %13 {strides = array<i32>} : memref<16x384xbf16, #tpu.memory_space<vmem>>, vector<16x384xbf16>,
    } else {
    }
    return
  }
  func.func @transform_0(%arg0: i32, %arg1: i32, %arg2: i32) -> (i32, i32) {
    %c0_i32 = arith.constant 0 : i32
    return %arg0, %arg2 : i32, i32
  }
  func.func @transform_1(%arg0: i32, %arg1: i32, %arg2: i32) -> (i32, i32) {
    %c0_i32 = arith.constant 0 : i32
    return %arg2, %arg1 : i32, i32
  }
  func.func @transform_2(%arg0: i32, %arg1: i32, %arg2: i32) -> (i32, i32) {
    %c0_i32 = arith.constant 0 : i32
    return %arg0, %arg1 : i32, i32
  }
}

</mosaic_0001>

<bundles_post_ra>
// kernel: tpu_custom_call.1
= control target key start
LH: loop header
LB: loop body
LE: loop exit
PB: predicated region body
PF: predicated region fallthrough
CT: control target
= control target key end

     0   :  { %7 = vsyncpa [#allocation4], 0  ;;  %s566_s0 = inlined_call_operand.hbm [shape: bf16[16,128], index: 0, kind: input, shape index: {}]   ;;  %s567_s1 = inlined_call_operand.hbm [shape: bf16[128,384], index: 1, kind: input, shape index: {}]   ;;  %s568_s2 = inlined_call_operand.hbm [shape: bf16[16,384], index: 2, kind: output, shape index: {}]  }
   0x1   :  { %8 = vsyncpa [#allocation7], 0 }
   0x2   :  { %9 = vsyncpa [#allocation5], 0  ;;  %s14_s11 = sshll.u32 %s566_s0, 4  ;;  %s529_s12 = smov [#allocation3]   ;;  %s15_s11 = int_to_ptr.hbm [resolvable:$true] %s14_s11 }
   0x3   :  { %s16_s13 = sshll.u32 %s529_s12, 4  ;;  %s27_s16 = sshll.u32 %s567_s1, 4  ;;  %s17_s13 = int_to_ptr.vmem [resolvable:$true] %s16_s13  ;;  %s28_s16 = int_to_ptr.hbm [resolvable:$true] %s27_s16 }
   0x4   :  { %s530_s17 = smov 64   ;;  %s531_s18 = smov 4  }
   0x5   :  { %22 = dma.hbm_to_vmem [thread:$0]  %s15_s11, 128, %s17_s13, [#allocation4], %s530_s17, %s530_s17, %s531_s18  }
   0x6   :  { %s532_s19 = smov [#allocation6]   ;;  %s533_s21 = smov 192  }
   0x7   :  { %s29_s20 = sshll.u32 %s532_s19, 4  ;;  %s534_s22 = smov 12   ;;  %s30_s20 = int_to_ptr.vmem [resolvable:$true] %s29_s20 }
   0x8   :  { %35 = dma.hbm_to_vmem [thread:$0]  %s28_s16, 3072, %s30_s20, [#allocation7], %s533_s21, %s533_s21, %s534_s22  }
   0x9   :  { %523 = dma.done.wait [#allocation4], 128  }
   0xa   :  { %524 = vsyncadd [#allocation4], 4294967168 }
   0xb   :  { %525 = dma.done.wait [#allocation7], 3072  }
   0xc   :  { %526 = vsyncadd [#allocation7], 4294964224  ;;  %v409_v0 = vld [vmem:[#allocation6 + $0xa8] sm:$0xf]  ;;  %v442_v1 = vld [vmem:[#allocation6 + $0xb0] sm:$0xf0] }
   0xd   :  { %v441_v2 = vld [vmem:[#allocation6 + $0xac] sm:$0xf]  ;;  %v410_v3 = vor.u32 %v442_v1, %v409_v0  ;;  %v411_v4 = vld [vmem:[#allocation6 + $0xb4] sm:$0xf0]  ;;  %v417_v5 = vld [vmem:[#allocation6 + $0xb0] sm:$0xf] }
   0xe   :  { %v443_v6 = vld [vmem:[#allocation6 + $0xb8] sm:$0xf0]  ;;  %v414_v7 = vor.u32 %v441_v2, %v411_v4  ;;  %v397_v9 = vld [vmem:[#allocation6 + $0x90] sm:$0xf]  ;;  %v438_v11 = vld [vmem:[#allocation6 + $0x94] sm:$0xf] }
   0xf   :  { %v418_v8 = vor.u32 %v443_v6, %v417_v5  ;;  %v439_v10 = vld [vmem:[#allocation6 + $0x98] sm:$0xf0]  ;;  %228 = vmatpush.bf16.msra.mxu0 %v410_v3  ;;  %v399_v13 = vld [vmem:[#allocation6 + $0x9c] sm:$0xf0]  ;;  %v405_v14 = vld [vmem:[#allocation6 + $0x98] sm:$0xf] }
  0x10   :  { %v398_v12 = vor.u32 %v439_v10, %v397_v9  ;;  %v440_v15 = vld [vmem:[#allocation6 + $0xa0] sm:$0xf0]  ;;  %242 = vmatpush.bf16.msra.mxu1 %v414_v7  ;;  %v402_v16 = vor.u32 %v438_v11, %v399_v13  ;;  %v385_v18 = vld [vmem:[#allocation6 + $0x78] sm:$0xf]  ;;  %v435_v20 = vld [vmem:[#allocation6 + $0x7c] sm:$0xf] }
  0x11   :  { %256 = vmatpush.bf16.msra.mxu2 %v418_v8  ;;  %v406_v17 = vor.u32 %v440_v15, %v405_v14  ;;  %v436_v19 = vld [vmem:[#allocation6 + $0x80] sm:$0xf0]  ;;  %v387_v21 = vld [vmem:[#allocation6 + $0x84] sm:$0xf0]  ;;  %v393_v22 = vld [vmem:[#allocation6 + $0x80] sm:$0xf] }
  0x12   :  { %v437_v23 = vld [vmem:[#allocation6 + $0x88] sm:$0xf0]  ;;  %v386_v24 = vor.u32 %v436_v19, %v385_v18  ;;  %v390_v25 = vor.u32 %v435_v20, %v387_v21  ;;  %v373_v27 = vld [vmem:[#allocation6 + $0x60] sm:$0xf]  ;;  %v432_v29 = vld [vmem:[#allocation6 + $0x64] sm:$0xf] }
  0x13   :  { %229 = vmatpush.bf16.msra.mxu0 %v398_v12  ;;  %v394_v26 = vor.u32 %v437_v23, %v393_v22  ;;  %v433_v28 = vld [vmem:[#allocation6 + $0x68] sm:$0xf0]  ;;  %v375_v30 = vld [vmem:[#allocation6 + $0x6c] sm:$0xf0]  ;;  %v381_v31 = vld [vmem:[#allocation6 + $0x68] sm:$0xf] }
  0x14   :  { %243 = vmatpush.bf16.msra.mxu1 %v402_v16  ;;  %v434_v32 = vld [vmem:[#allocation6 + $0x70] sm:$0xf0]  ;;  %v374_v33 = vor.u32 %v433_v28, %v373_v27  ;;  %v378_v34 = vor.u32 %v432_v29, %v375_v30  ;;  %v361_v36 = vld [vmem:[#allocation6 + $0x48] sm:$0xf]  ;;  %v429_v38 = vld [vmem:[#allocation6 + $0x4c] sm:$0xf] }
  0x15   :  { %257 = vmatpush.bf16.msra.mxu2 %v406_v17  ;;  %v382_v35 = vor.u32 %v434_v32, %v381_v31  ;;  %v430_v37 = vld [vmem:[#allocation6 + $0x50] sm:$0xf0]  ;;  %v363_v39 = vld [vmem:[#allocation6 + $0x54] sm:$0xf0]  ;;  %v369_v40 = vld [vmem:[#allocation6 + $0x50] sm:$0xf] }
  0x16   :  { %v431_v41 = vld [vmem:[#allocation6 + $0x58] sm:$0xf0]  ;;  %v362_v42 = vor.u32 %v430_v37, %v361_v36  ;;  %v366_v43 = vor.u32 %v429_v38, %v363_v39  ;;  %v349_v45 = vld [vmem:[#allocation6 + $0x30] sm:$0xf]  ;;  %v426_v47 = vld [vmem:[#allocation6 + $0x34] sm:$0xf] }
  0x17   :  { %230 = vmatpush.bf16.msra.mxu0 %v386_v24  ;;  %v370_v44 = vor.u32 %v431_v41, %v369_v40  ;;  %v427_v46 = vld [vmem:[#allocation6 + $0x38] sm:$0xf0]  ;;  %v351_v48 = vld [vmem:[#allocation6 + $0x3c] sm:$0xf0]  ;;  %v357_v49 = vld [vmem:[#allocation6 + $0x38] sm:$0xf] }
  0x18   :  { %244 = vmatpush.bf16.msra.mxu1 %v390_v25  ;;  %v428_v50 = vld [vmem:[#allocation6 + $0x40] sm:$0xf0]  ;;  %v350_v51 = vor.u32 %v427_v46, %v349_v45  ;;  %v354_v52 = vor.u32 %v426_v47, %v351_v48  ;;  %v337_v54 = vld [vmem:[#allocation6 + $0x18] sm:$0xf]  ;;  %v423_v56 = vld [vmem:[#allocation6 + $0x1c] sm:$0xf] }
  0x19   :  { %258 = vmatpush.bf16.msra.mxu2 %v394_v26  ;;  %v358_v53 = vor.u32 %v428_v50, %v357_v49  ;;  %v424_v55 = vld [vmem:[#allocation6 + $0x20] sm:$0xf0]  ;;  %v339_v57 = vld [vmem:[#allocation6 + $0x24] sm:$0xf0]  ;;  %v345_v58 = vld [vmem:[#allocation6 + $0x20] sm:$0xf] }
  0x1a   :  { %v425_v59 = vld [vmem:[#allocation6 + $0x28] sm:$0xf0]  ;;  %v338_v60 = vor.u32 %v424_v55, %v337_v54  ;;  %v342_v61 = vor.u32 %v423_v56, %v339_v57  ;;  %v325_v63 = vld [vmem:[#allocation6] sm:$0xf]  ;;  %v420_v1 = vld [vmem:[#allocation6 + $0x4] sm:$0xf] }
  0x1b   :  { %231 = vmatpush.bf16.msra.mxu0 %v374_v33  ;;  %v346_v62 = vor.u32 %v425_v59, %v345_v58  ;;  %v421_v0 = vld [vmem:[#allocation6 + $0x8] sm:$0xf0]  ;;  %v327_v2 = vld [vmem:[#allocation6 + $0xc] sm:$0xf0]  ;;  %v333_v3 = vld [vmem:[#allocation6 + $0x8] sm:$0xf] }
  0x1c   :  { %245 = vmatpush.bf16.msra.mxu1 %v378_v34  ;;  %v422_v4 = vld [vmem:[#allocation6 + $0x10] sm:$0xf0]  ;;  %v326_v5 = vor.u32 %v421_v0, %v325_v63  ;;  %v330_v6 = vor.u32 %v420_v1, %v327_v2  ;;  %v419_v8 = vld [vmem:[#allocation3] sm:$0xff]  ;;  %s535_s0 = smov [#allocation8]   ;;  %s305_s25 = sshll.u32 %s568_s2, 4  ;;  %s306_s25 = int_to_ptr.hbm [resolvable:$true] %s305_s25 }
  0x1d   :  { %259 = vmatpush.bf16.msra.mxu2 %v382_v35  ;;  %v334_v7 = vor.u32 %v422_v4, %v333_v3  ;;  %s303_s1 = sshll.u32 %s535_s0, 4  ;;  %s304_s1 = int_to_ptr.vmem [resolvable:$true] %s303_s1 }
  0x1f   :  { %232 = vmatpush.bf16.msra.mxu0 %v362_v42 }
  0x20   :  { %246 = vmatpush.bf16.msra.mxu1 %v366_v43 }
  0x21   :  { %260 = vmatpush.bf16.msra.mxu2 %v370_v44 }
  0x23   :  { %233 = vmatpush.bf16.msra.mxu0 %v350_v51 }
  0x24   :  { %247 = vmatpush.bf16.msra.mxu1 %v354_v52 }
  0x25   :  { %261 = vmatpush.bf16.msra.mxu2 %v358_v53 }
  0x27   :  { %234 = vmatpush.bf16.msra.mxu0 %v338_v60 }
  0x28   :  { %248 = vmatpush.bf16.msra.mxu1 %v342_v61 }
  0x29   :  { %262 = vmatpush.bf16.msra.mxu2 %v346_v62 }
  0x2b   :  { %235 = vmatpush.bf16.msra.mxu0 %v326_v5 }
  0x2c   :  { %249 = vmatpush.bf16.msra.mxu1 %v330_v6 }
  0x2d   :  { %263 = vmatpush.bf16.msra.mxu2 %v334_v7 }
  0x2e   :  { %236 = vmatmul.bf16.vlgmr.msra.gmra.mxu0 %v419_v8 }
  0x2f   :  { %250 = vmatmul.bf16.vlgmr.msra.gmra.mxu1 %v419_v8 }
  0x30   :  { %264 = vmatmul.bf16.vlgmr.msra.gmra.mxu2 %v419_v8 }
  0xab   :  { %v237_v9 = vpop.f32.mrf.mxu0 }
  0xac   :  { %v251_v10 = vpop.f32.mrf.mxu1 }
  0xad   :  { %v291_v11 = vpack.c.bf16 %v251_v10, %v237_v9 }
  0xaf   :  { %295 = vst [vmem:[#allocation8] sm:$0xff] %v291_v11 }
  0xb3   :  { %v265_v12 = vpop.f32.mrf.mxu2  ;;  %v239_v14 = vpop.f32.mrf.mxu0 }
  0xb4   :  { %v292_v13 = vpack.c.bf16 %v265_v12, %v265_v12  ;;  %v253_v15 = vpop.f32.mrf.mxu1 }
  0xb5   :  { %v293_v16 = vpack.c.bf16 %v253_v15, %v239_v14 }
  0xb6   :  { %296 = vst [vmem:[#allocation8 + $0x8] sm:$0xf] %v292_v13 }
  0xb7   :  { %297 = vst [vmem:[#allocation8 + $0xc] sm:$0xff] %v293_v16 }
  0xbb   :  { %v267_v17 = vpop.f32.mrf.mxu2 }
  0xbc   :  { %v294_v18 = vpack.c.bf16 %v267_v17, %v267_v17 }
  0xbe   :  { %298 = vst [vmem:[#allocation8 + $0x14] sm:$0xf] %v294_v18 }
  0xbf   :  { %311 = dma.vmem_to_hbm [thread:$0]  %s304_s1, 384, %s306_s25, [#allocation5], %s533_s21, %s533_s21, %s534_s22  }
  0xc0   :  { %527 = dma.done.wait [#allocation5], 384  }
  0xc1   :  { %528 = vsyncadd [#allocation5], 4294966912 }
  0xc2   :  { %316 = vsyncpa [#allocation4], 1 }
  0xc3   :  { %317 = vsyncpa [#allocation7], 1 }
  0xc4   :  { %318 = vsyncpa [#allocation5], 1 }

</bundles_post_ra>
